<compile_context>
chip_gen: v5e
topology: v5e:2x2
jax: 0.10.0
libtpu: 0.0.40
codegen_flags: <defaults>
</compile_context>

<pallas_src>
import math

import jax
import jax.numpy as jnp
from jax.experimental import pallas as pl
from jax.experimental.pallas import tpu as pltpu


def _leaky_relu(x, slope=0.01):
    # valid for slope in (0,1): max(x, slope*x) == leaky_relu(x)
    return jnp.maximum(x, slope * x)


def generator_kernel(z_ref,
                     w1_ref, b1_ref,
                     w2_ref, b2_ref,
                     w3_ref, b3_ref,
                     o_ref):
    # Layer 1: Linear (bf16 MXU, f32 accumulate) + bias + LeakyReLU (f32)
    h = jnp.dot(z_ref[...], w1_ref[...], preferred_element_type=jnp.float32)
    h = _leaky_relu(h + b1_ref[...])
    # Layer 2
    h = jnp.dot(h.astype(jnp.bfloat16), w2_ref[...],
                preferred_element_type=jnp.float32)
    h = _leaky_relu(h + b2_ref[...])
    # Layer 3 (output) + Tanh
    h = jnp.dot(h.astype(jnp.bfloat16), w3_ref[...],
                preferred_element_type=jnp.float32)
    o_ref[...] = jnp.tanh(h + b3_ref[...]).astype(o_ref.dtype)


def _pick_batch_tile(batch, cap=256):
    """Largest power-of-two tile (<= cap) that evenly divides the batch."""
    for tb in (256, 128, 64, 32, 16, 8):
        if tb <= cap and batch % tb == 0:
            return tb
    return batch  # tiny / odd batch: single full block


def generator_forward(z, params, batch_tile=None):
    """params = [(W1, b1), (W2, b2), (W3, b3)], W_i (in, out) bf16, b_i (1, out) f32."""
    (w1, b1), (w2, b2), (w3, b3) = params
    B = z.shape[0]
    d0 = w1.shape[0]
    d1, d2, d3 = w1.shape[1], w2.shape[1], w3.shape[1]

    tb = batch_tile if batch_tile is not None else _pick_batch_tile(B)
    assert B % tb == 0, f"batch {B} must be a multiple of the batch tile {tb}"
    grid = (B // tb,)

    z_bf16 = z.astype(jnp.bfloat16)

    # Activations: tiled along batch, pipelined across grid steps.
    z_spec = pl.BlockSpec((tb, d0), lambda i: (i, 0))
    o_spec = pl.BlockSpec((tb, d3), lambda i: (i, 0))
    # Weights/biases: full block, constant index_map -> stay resident in VMEM.
    resident = lambda a: pl.BlockSpec(a.shape, lambda i: (0,) * a.ndim)

    flops = 2 * B * (d0 * d1 + d1 * d2 + d2 * d3)
    bytes_accessed = (
        z_bf16.size * 2
        + (w1.size + w2.size + w3.size) * 2
        + (b1.size + b2.size + b3.size) * 4
        + B * d3 * 4
    )
    cost = pl.CostEstimate(
        flops=flops, transcendentals=B * d3, bytes_accessed=bytes_accessed)

    return pl.pallas_call(
        generator_kernel,
        out_shape=jax.ShapeDtypeStruct((B, d3), jnp.float32),
        grid=grid,
        in_specs=[z_spec,
                  resident(w1), resident(b1),
                  resident(w2), resident(b2),
                  resident(w3), resident(b3)],
        out_specs=o_spec,
        compiler_params=pltpu.CompilerParams(
            dimension_semantics=("parallel",)),
        cost_estimate=cost,
    )(z_bf16, w1, b1, w2, b2, w3, b3)


def init_linear(key, fan_in, fan_out):
    """Mimic torch.nn.Linear default init U(-1/sqrt(fan_in), +), W stored (in, out).
    Weights are kept in bf16 (fed to the MXU), biases in f32."""
    kw, kb = jax.random.split(key)
    bound = 1.0 / math.sqrt(fan_in)
    w = jax.random.uniform(kw, (fan_in, fan_out), jnp.float32, -bound, bound)
    b = jax.random.uniform(kb, (1, fan_out), jnp.float32, -bound, bound)
    return w.astype(jnp.bfloat16), b


def make_generator_params(key, input_size, hidden_sizes, output_size):
    sizes = [input_size] + list(hidden_sizes) + [output_size]
    params = []
    for j in range(len(sizes) - 1):
        key, sub = jax.random.split(key)
        params.append(init_linear(sub, sizes[j], sizes[j + 1]))
    return params


def reference_forward(z, params):
    """Pure-JAX reference with the same bf16-into-MXU / f32-accumulate recipe."""
    h = z.astype(jnp.bfloat16)
    n = len(params)
    for i, (w, b) in enumerate(params):
        h = jnp.dot(h, w, preferred_element_type=jnp.float32) + b
        if i < n - 1:
            h = _leaky_relu(h)
            h = h.astype(jnp.bfloat16)
        else:
            h = jnp.tanh(h)
    return h


if __name__ == "__main__":
    key = jax.random.PRNGKey(0)
    kz, kp = jax.random.split(key)

    # Module-consistent shapes: latent z of size 32, two hidden layers,
    # flattened image output of size 256 (e.g. 16x16).  Batch 256 with a
    # 128-row batch tile -> grid of 2, exercising the pipelined path.
    batch = 256
    input_size = 32
    hidden_sizes = [64, 128]
    output_size = 256

    z = jax.random.normal(kz, (batch, input_size), jnp.float32)
    params = make_generator_params(kp, input_size, hidden_sizes, output_size)

    out = generator_forward(z, params, batch_tile=128)
    out = jax.block_until_ready(out)

    ref = reference_forward(z, params)
    assert out.shape == (batch, output_size)
    assert jnp.allclose(out, ref, atol=1e-2, rtol=1e-2), (
        float(jnp.max(jnp.abs(out - ref))))

    print("KERNEL_OK")
</pallas_src>

<mosaic_0001>
module attributes {stable_mosaic.version = 11 : i64} {
  func.func @generator_kernel(%arg0: i32, %arg1: memref<128x32xbf16, #tpu.memory_space<vmem>>, %arg2: memref<32x64xbf16, #tpu.memory_space<vmem>>, %arg3: memref<1x64xf32, #tpu.memory_space<vmem>>, %arg4: memref<64x128xbf16, #tpu.memory_space<vmem>>, %arg5: memref<1x128xf32, #tpu.memory_space<vmem>>, %arg6: memref<128x256xbf16, #tpu.memory_space<vmem>>, %arg7: memref<1x256xf32, #tpu.memory_space<vmem>>, %arg8: memref<128x256xf32, #tpu.memory_space<vmem>>) attributes {dimension_semantics = [#tpu.dimension_semantics<parallel>], iteration_bounds = array<i64: 2>, scalar_prefetch = 0 : i64, scratch_operands = 0 : i64, tpu.core_type = #tpu.core_type<tc>, window_params = [{transform_indices = @transform_0, window_bounds = array<i64: 128, 32>}, {pipeline_mode = #tpu.pipeline_mode<synchronous>, transform_indices = @transform_1, window_bounds = array<i64: 32, 64>}, {pipeline_mode = #tpu.pipeline_mode<synchronous>, transform_indices = @transform_2, window_bounds = array<i64: 1, 64>}, {pipeline_mode = #tpu.pipeline_mode<synchronous>, transform_indices = @transform_3, window_bounds = array<i64: 64, 128>}, {pipeline_mode = #tpu.pipeline_mode<synchronous>, transform_indices = @transform_4, window_bounds = array<i64: 1, 128>}, {pipeline_mode = #tpu.pipeline_mode<synchronous>, transform_indices = @transform_5, window_bounds = array<i64: 128, 256>}, {pipeline_mode = #tpu.pipeline_mode<synchronous>, transform_indices = @transform_6, window_bounds = array<i64: 1, 256>}, {transform_indices = @transform_7, window_bounds = array<i64: 128, 256>}]} {
    %c0 = arith.constant 0 : index
    %c0_0 = arith.constant 0 : index
    %0 = vector.load %arg1[%c0, %c0_0] : memref<128x32xbf16, #tpu.memory_space<vmem>>, vector<128x32xbf16>
    %c0_1 = arith.constant 0 : index
    %c0_2 = arith.constant 0 : index
    %1 = vector.load %arg2[%c0_1, %c0_2] : memref<32x64xbf16, #tpu.memory_space<vmem>>, vector<32x64xbf16>
    %cst = arith.constant dense<0.000000e+00> : vector<128x64xf32>
    %2 = tpu.matmul %0, %1, %cst {dimension_numbers = #tpu.dot_dimension_numbers<[1], [0], [0], [1], [0, 0, 1, 1], [], []>} : vector<128x32xbf16>, vector<32x64xbf16>, vector<128x64xf32> -> vector<128x64xf32>
    %c0_3 = arith.constant 0 : index
    %c0_4 = arith.constant 0 : index
    %3 = vector.load %arg3[%c0_3, %c0_4] : memref<1x64xf32, #tpu.memory_space<vmem>>, vector<1x64xf32>
    %4 = vector.broadcast %3 : vector<1x64xf32> to vector<128x64xf32>
    %5 = arith.addf %2, %4 : vector<128x64xf32>
    %cst_5 = arith.constant 0.00999999977 : f32
    %6 = vector.broadcast %cst_5 : f32 to vector<128x64xf32>
    %7 = arith.mulf %6, %5 : vector<128x64xf32>
    %8 = arith.maximumf %5, %7 : vector<128x64xf32>
    %9 = arith.truncf %8 : vector<128x64xf32> to vector<128x64xbf16>
    %c0_6 = arith.constant 0 : index
    %c0_7 = arith.constant 0 : index
    %10 = vector.load %arg4[%c0_6, %c0_7] : memref<64x128xbf16, #tpu.memory_space<vmem>>, vector<64x128xbf16>
    %cst_8 = arith.constant dense<0.000000e+00> : vector<128x128xf32>
    %11 = tpu.matmul %9, %10, %cst_8 {dimension_numbers = #tpu.dot_dimension_numbers<[1], [0], [0], [1], [0, 0, 1, 1], [], []>} : vector<128x64xbf16>, vector<64x128xbf16>, vector<128x128xf32> -> vector<128x128xf32>
    %c0_9 = arith.constant 0 : index
    %c0_10 = arith.constant 0 : index
    %12 = vector.load %arg5[%c0_9, %c0_10] : memref<1x128xf32, #tpu.memory_space<vmem>>, vector<1x128xf32>
    %13 = vector.broadcast %12 : vector<1x128xf32> to vector<128x128xf32>
    %14 = arith.addf %11, %13 : vector<128x128xf32>
    %cst_11 = arith.constant 0.00999999977 : f32
    %15 = vector.broadcast %cst_11 : f32 to vector<128x128xf32>
    %16 = arith.mulf %15, %14 : vector<128x128xf32>
    %17 = arith.maximumf %14, %16 : vector<128x128xf32>
    %18 = arith.truncf %17 : vector<128x128xf32> to vector<128x128xbf16>
    %c0_12 = arith.constant 0 : index
    %c0_13 = arith.constant 0 : index
    %19 = vector.load %arg6[%c0_12, %c0_13] : memref<128x256xbf16, #tpu.memory_space<vmem>>, vector<128x256xbf16>
    %cst_14 = arith.constant dense<0.000000e+00> : vector<128x256xf32>
    %20 = tpu.matmul %18, %19, %cst_14 {dimension_numbers = #tpu.dot_dimension_numbers<[1], [0], [0], [1], [0, 0, 1, 1], [], []>} : vector<128x128xbf16>, vector<128x256xbf16>, vector<128x256xf32> -> vector<128x256xf32>
    %c0_15 = arith.constant 0 : index
    %c0_16 = arith.constant 0 : index
    %21 = vector.load %arg7[%c0_15, %c0_16] : memref<1x256xf32, #tpu.memory_space<vmem>>, vector<1x256xf32>
    %22 = vector.broadcast %21 : vector<1x256xf32> to vector<128x256xf32>
    %23 = arith.addf %20, %22 : vector<128x256xf32>
    %24 = math.tanh %23 : vector<128x256xf32>
    %c0_17 = arith.constant 0 : index
    %c0_18 = arith.constant 0 : index
    %25 = vector.load %arg8[%c0_17, %c0_18] : memref<128x256xf32, #tpu.memory_space<vmem>>, vector<128x256xf32>
    tpu.vector_store %arg8[%c0_17, %c0_18], %24 {strides = array<i32>} : memref<128x256xf32, #tpu.memory_space<vmem>>, vector<128x256xf32>,
    return
  }
  func.func @transform_0(%arg0: i32) -> (i32, i32) {
    %c0_i32 = arith.constant 0 : i32
    %c0_i32_0 = arith.constant 0 : i32
    return %arg0, %c0_i32 : i32, i32
  }
  func.func @transform_1(%arg0: i32) -> (i32, i32) {
    %c0_i32 = arith.constant 0 : i32
    %c0_i32_0 = arith.constant 0 : i32
    %c0_i32_1 = arith.constant 0 : i32
    return %c0_i32, %c0_i32_0 : i32, i32
  }
  func.func @transform_2(%arg0: i32) -> (i32, i32) {
    %c0_i32 = arith.constant 0 : i32
    %c0_i32_0 = arith.constant 0 : i32
    %c0_i32_1 = arith.constant 0 : i32
    return %c0_i32, %c0_i32_0 : i32, i32
  }
  func.func @transform_3(%arg0: i32) -> (i32, i32) {
    %c0_i32 = arith.constant 0 : i32
    %c0_i32_0 = arith.constant 0 : i32
    %c0_i32_1 = arith.constant 0 : i32
    return %c0_i32, %c0_i32_0 : i32, i32
  }
  func.func @transform_4(%arg0: i32) -> (i32, i32) {
    %c0_i32 = arith.constant 0 : i32
    %c0_i32_0 = arith.constant 0 : i32
    %c0_i32_1 = arith.constant 0 : i32
    return %c0_i32, %c0_i32_0 : i32, i32
  }
  func.func @transform_5(%arg0: i32) -> (i32, i32) {
    %c0_i32 = arith.constant 0 : i32
    %c0_i32_0 = arith.constant 0 : i32
    %c0_i32_1 = arith.constant 0 : i32
    return %c0_i32, %c0_i32_0 : i32, i32
  }
  func.func @transform_6(%arg0: i32) -> (i32, i32) {
    %c0_i32 = arith.constant 0 : i32
    %c0_i32_0 = arith.constant 0 : i32
    %c0_i32_1 = arith.constant 0 : i32
    return %c0_i32, %c0_i32_0 : i32, i32
  }
  func.func @transform_7(%arg0: i32) -> (i32, i32) {
    %c0_i32 = arith.constant 0 : i32
    %c0_i32_0 = arith.constant 0 : i32
    return %arg0, %c0_i32 : i32, i32
  }
}

</mosaic_0001>

<bundles_post_ra>
// kernel: tpu_custom_call.1
= control target key start
LH: loop header
LB: loop body
LE: loop exit
PB: predicated region body
PF: predicated region fallthrough
CT: control target
= control target key end

     0   :  { %12 = vsyncpa [#allocation3], 0  ;;  %s1777_s0 = inlined_call_operand.vmem [shape: bf16[256,32], index: 0, kind: input, shape index: {}]   ;;  %s1778_s1 = inlined_call_operand.hbm [shape: bf16[32,64], index: 1, kind: input, shape index: {}]   ;;  %s1779_s2 = inlined_call_operand.vmem [shape: f32[1,64], index: 2, kind: input, shape index: {}]   ;;  %s1780_s3 = inlined_call_operand.vmem [shape: bf16[64,128], index: 3, kind: input, shape index: {}]   ;;  %s1781_s4 = inlined_call_operand.vmem [shape: f32[1,128], index: 4, kind: input, shape index: {}]   ;;  %s1782_s5 = inlined_call_operand.vmem [shape: bf16[128,256], index: 5, kind: input, shape index: {}]   ;;  %s1783_s6 = inlined_call_operand.vmem [shape: f32[1,256], index: 6, kind: input, shape index: {}]   ;;  %s1784_s7 = inlined_call_operand.hbm [shape: f32[256,256], index: 7, kind: output, shape index: {}]  }
   0x1   :  { %13 = vsyncpa [#allocation4], 0 }
   0x2   :  { %15 = vsyncpa [#allocation4 + $0x1], 0  ;;  %s1439_s24 = smov 0   ;;  %s1441_s25 = smov 0  }
   0x3   :  { %s1443_s26 = smov 0   ;;  %s1445_s27 = smov 0  }
   0x4 LB: > { %s1460_s28 = sadd.s32 4294967295, %s1392_s27   ;;  %s993_s29 = sadd.s32 4294967294, %s1392_s27   ;;  %s1392_s27 = sphi %s1445_s27, %s1790_s27   ;;  %s1388_s26 = sphi %s1443_s26, %s1789_s26   ;;  %s1384_s25 = sphi %s1441_s25, %s1788_s25   ;;  %s1380_s24 = sphi %s1439_s24, %s1787_s24  }
   0x5   : > { %s1464_s30 = sadd.s32 1, %s1392_s27   ;;  %s180_s8 = sadd.s32 1, %s1388_s26 }
   0x6   : > { %s177_s9 = ssub.s32 %s1392_s27, %s1464_s30  ;;  %p190_p0 = scmp.ne.s32.totalorder %s1388_s26, %s1384_s25 }
   0x7   : > { %p178_p1 = scmp.eq.s32.totalorder %s177_s9, 0  ;;  %p191_p2 = scmp.eq.s32.totalorder %s1460_s28, 1 }
   0x8   : > { %p196_p3 = scmp.ne.s32.totalorder %s1384_s25, %s1380_s24  ;;  %p197_p4 = scmp.eq.s32.totalorder %s993_s29, 1 }
   0x9   : > { %s1475_s10 = scalar_select %p178_p1, %s1388_s26, %s180_s8  }
   0xa   : > { %p1477_p5 = por %p191_p2, %p190_p0  ;;  %p1481_p6 = por %p197_p4, %p196_p3 }
   0xb   : > { %p994_p7 = scmp.ge.s32.totalorder %s1392_s27, 1  ;;  %p204_p8 = scmp.lt.s32.totalorder %s1392_s27, 3 }
   0xc   : > { %p1190_p9 = scmp.eq.s32.totalorder %s1460_s28, 0  ;;  %s215_s15 = sshll.u32 %s1778_s1, 4  ;;  %s216_s15 = int_to_ptr.hbm [resolvable:$true] %s215_s15 }
   0xd   : > { %p205_p10 = pnand %p994_p7, %p204_p8  ;;  %s1394_s16 = smov [#allocation2]  }
   0xe   : > { %s217_s17 = sshll.u32 %s1394_s16, 4  ;;  %s1395_s18 = smov 64   ;;  %s218_s17 = int_to_ptr.vmem [resolvable:$true] %s217_s17 }
   0xf   : > { %p1182_p11 = pneg %p205_p10  ;;  %s1396_s19 = smov 4  }
  0x10   : > { %257 = sbr.rel (%p205_p10) target bundleno = 580 (0x244), region = 48 }
  0x11   : > { %p1183_p12 = pnand %p1190_p9, %p1182_p11 }
  0x13   : > { %1185 = dma.hbm_to_vmem [thread:$0]  (!%p1183_p12), %s216_s15, 256, %s218_s17, [#allocation3], %s1395_s18, %s1395_s18, %s1396_s19  }
  0x15   : > { %1371 = dma.done.wait (%p1190_p9), [#allocation3], 256  }
  0x16   : > { %1373 = vsyncadd (%p1190_p9), [#allocation3], 4294967040  ;;  %s1000_s20 = sshll.u32 %s1460_s28, 4  ;;  %v1153_v0 = vld [vmem:[#allocation2 + $0x8] sm:$0xff]  ;;  %v1152_v1 = vld [vmem:[#allocation2] sm:$0xff]  ;;  %vm374_vm0 = vcmask 261120  }
  0x17   : > { %p291_p13 = scmp.lt.s32.totalorder %s1000_s20, 31  ;;  %405 = vmatpush.bf16.msra.mxu0 %v1153_v0  ;;  %v1157_v9 = vld [vmem:[%s1780_s3 + $0x18] sm:$0xff]  ;;  %v1156_v10 = vld [vmem:[%s1780_s3 + $0x10] sm:$0xff]  ;;  %v1155_v11 = vld [vmem:[%s1780_s3 + $0x8] sm:$0xff]  ;;  %vm524_vm1 = vcmask 523264   ;;  %s287_s19 = sand.u32 1, %s1384_s25  }
  0x18   : > { %553 = vmatpush.bf16.msra.mxu1 %v1157_v9  ;;  %v1154_v12 = vld [vmem:[%s1780_s3] sm:$0xff]  ;;  %s1175_s22 = sshll.u32 %s1460_s28, 8  ;;  %s903_s13 = scalar_lea.sflag [#allocation4], %s287_s19 }
  0x19   : > { %s1792_s20 = smov (!%p291_p13, %s1000_s20), 31  ;;  %v1524_v15 = vld [vmem:[%s1779_s2] ss:$0 sm:$0xff]  ;;  %s915_s8 = scalar_lea.hbm %s1784_s7, %s1175_s22 }
  0x1a   : > { %s1001_s21 = sshll.u32 %s1792_s20, 2  ;;  %s999_s20 = sshll.u32 %s287_s19, 8 }
  0x1b   : > { %s294_s29 = scalar_lea.vmem %s1777_s0, %s1001_s21  ;;  %406 = vmatpush.bf16.msra.mxu0 %v1152_v1  ;;  %s1681_s21 = scalar_lea.vmem [#allocation5], %s999_s20 }
  0x1c   : > { %v1144_v2 = vld [vmem:[%s294_s29] sm:$0xff]  ;;  %v1145_v3 = vld [vmem:[%s294_s29 + $0x8] sm:$0xff]  ;;  %v1146_v4 = vld [vmem:[%s294_s29 + $0x10] sm:$0xff]  ;;  %554 = vmatpush.bf16.msra.mxu1 %v1156_v10  ;;  %s916_s28 = sshll.u32 %s1681_s21, 4  ;;  %s918_s9 = sshll.u32 %s915_s8, 4  ;;  %s917_s28 = int_to_ptr.vmem [resolvable:$true] %s916_s28  ;;  %s919_s9 = int_to_ptr.hbm [resolvable:$true] %s918_s9 }
  0x1d   : > { %v1147_v5 = vld [vmem:[%s294_s29 + $0x18] sm:$0xff]  ;;  %v1148_v6 = vld [vmem:[%s294_s29 + $0x20] sm:$0xff]  ;;  %v1149_v7 = vld [vmem:[%s294_s29 + $0x28] sm:$0xff]  ;;  %s1340_s14 = sshra.s32 %s919_s9, 4  ;;  %s1346_s18 = scalar_lea.hbm %s1784_s7, 512  ;;  %s1341_s14 = int_to_ptr.hbm [resolvable:$true] %s1340_s14 }
  0x1e   : > { %1042 = vmatmul.msk.bf16.vlgmr.msra.gmra.mxu0 %vm374_vm0, %v1144_v2  ;;  %v1150_v8 = vld [vmem:[%s294_s29 + $0x30] sm:$0xff]  ;;  %v1151_v13 = vld [vmem:[%s294_s29 + $0x38] sm:$0xff]  ;;  %s1342_s15 = scalar_lea.hbm %s1341_s14, 256  ;;  %p1347_p3 = scmp.lt.s32.totalorder %s1341_s14, %s1784_s7 }
  0x1f   : > { %p1343_p0 = scmp.ne.s32.totalorder %s1341_s14, %s1342_s15  ;;  %p1348_p4 = scmp.lt.s32.totalorder %s1346_s18, %s1342_s15 }
  0x20   : > { %555 = vmatpush.bf16.msra.mxu1 %v1155_v11 }
  0x21   : > { %p1344_p1 = pnand %p1343_p0, %p1477_p5  ;;  %p1349_p7 = por %p1348_p4, %p1347_p3 }
  0x23   : > { %p1345_p2 = pneg %p1344_p1 }
  0x24   : > { %556 = vmatpush.bf16.msra.mxu1 %v1154_v12  ;;  %v1124_v12 = vld [vmem:[%s1782_s5 + $0x60] sm:$0xf] }
  0x25   : > { %p1350_p8 = pnand %p1349_p7, %p1345_p2 }
  0x2e   : > { %1043 = vmatmul.msk.bf16.gmra.mxu0 %vm374_vm0, %v1145_v3 }
  0x3e   : > { %1044 = vmatmul.msk.bf16.gmra.mxu0 %vm374_vm0, %v1146_v4  ;;  %v1132_v4 = vld [vmem:[%s1782_s5 + $0x70] sm:$0xf] }
  0x4e   : > { %1045 = vmatmul.msk.bf16.gmra.mxu0 %vm374_vm0, %v1147_v5  ;;  %v1173_v5 = vld [vmem:[%s1782_s5 + $0x74] sm:$0xf0] }
  0x5e   : > { %1046 = vmatmul.msk.bf16.gmra.mxu0 %vm374_vm0, %v1148_v6  ;;  %v1172_v6 = vld [vmem:[%s1782_s5 + $0x74] sm:$0xf] }
  0x6e   : > { %1047 = vmatmul.msk.bf16.gmra.mxu0 %vm374_vm0, %v1149_v7  ;;  %v1133_v7 = vor.u32 %v1173_v5, %v1132_v4 }
  0x70   : > { %740 = vmatpush.bf16.msra.mxu2 %v1133_v7 }
  0x7e   : > { %1048 = vmatmul.msk.bf16.gmra.mxu0 %vm374_vm0, %v1150_v8  ;;  %v1134_v8 = vld [vmem:[%s1782_s5 + $0x78] sm:$0xf0] }
  0x7f   : > { %v1137_v10 = vor.u32 %v1172_v6, %v1134_v8  ;;  %v1649_v8 = vld [vmem:[%s1781_s4] ss:$0 sm:$0xff] }
  0x81   : > { %789 = vmatpush.bf16.msra.mxu3 %v1137_v10 }
  0x8e   : > { %1049 = vmatmul.msk.bf16.gmra.mxu0 %vm374_vm0, %v1151_v13  ;;  %v1171_v13 = vld [vmem:[%s1782_s5 + $0x64] sm:$0xf0] }
  0x9b   : > { %v408_v14 = vpop.f32.mrf.mxu0 }
  0x9c   : > { %v409_v16 = vadd.f32 %v1524_v15, %v408_v14  ;;  %v1170_v14 = vld [vmem:[%s1782_s5 + $0x64] sm:$0xf] }
  0x9e   : > { %v448_v18 = vmul.f32 0.01, %v409_v16 }
  0xa0   : > { %v464_v21 = vmax.f32 %v409_v16, %v448_v18  ;;  %v1125_v16 = vor.u32 %v1171_v13, %v1124_v12  ;;  %v1116_v18 = vld [vmem:[%s1782_s5 + $0x50] sm:$0xf] }
  0xa2   : > { %741 = vmatpush.bf16.msra.mxu2 %v1125_v16 }
  0xa3   : > { %v410_v17 = vpop.f32.mrf.mxu0 }
  0xa4   : > { %v411_v19 = vadd.f32 %v1524_v15, %v410_v17  ;;  %v1126_v17 = vld [vmem:[%s1782_s5 + $0x68] sm:$0xf0] }
  0xa6   : > { %v449_v20 = vmul.f32 0.01, %v411_v19 }
  0xa8   : > { %v465_v22 = vmax.f32 %v411_v19, %v449_v20  ;;  %v1169_v19 = vld [vmem:[%s1782_s5 + $0x54] sm:$0xf0]  ;;  %v1129_v20 = vor.u32 %v1170_v14, %v1126_v17 }
  0xaa   : > { %v480_v23 = vpack.c.bf16 %v465_v22, %v464_v21  ;;  %v1168_v21 = vld [vmem:[%s1782_s5 + $0x54] sm:$0xf]  ;;  %v1118_v22 = vld [vmem:[%s1782_s5 + $0x58] sm:$0xf0]  ;;  %790 = vmatpush.bf16.msra.mxu3 %v1129_v20 }
  0xab   : > { %v413_v24 = vpop.f32.mrf.mxu0 }
  0xac   : > { %1066 = vmatmul.msk.bf16.vlgmr.msra.gmra.mxu1 %vm524_vm1, %v480_v23  ;;  %v414_v25 = vadd.f32 %v1524_v15, %v413_v24  ;;  %v1117_v23 = vor.u32 %v1169_v19, %v1116_v18 }
  0xae   : > { %v450_v27 = vmul.f32 0.01, %v414_v25  ;;  %742 = vmatpush.bf16.msra.mxu2 %v1117_v23 }
  0xb0   : > { %v466_v30 = vmax.f32 %v414_v25, %v450_v27  ;;  %v1121_v25 = vor.u32 %v1168_v21, %v1118_v22  ;;  %v1167_v27 = vld [vmem:[%s1782_s5 + $0x44] sm:$0xf0] }
  0xb2   : > { %791 = vmatpush.bf16.msra.mxu3 %v1121_v25 }
  0xb3   : > { %v415_v26 = vpop.f32.mrf.mxu0 }
  0xb4   : > { %v416_v28 = vadd.f32 %v1524_v15, %v415_v26  ;;  %v1108_v26 = vld [vmem:[%s1782_s5 + $0x40] sm:$0xf] }
  0xb6   : > { %v451_v29 = vmul.f32 0.01, %v416_v28 }
  0xb8   : > { %v467_v31 = vmax.f32 %v416_v28, %v451_v29  ;;  %v1166_v28 = vld [vmem:[%s1782_s5 + $0x44] sm:$0xf]  ;;  %v1110_v29 = vld [vmem:[%s1782_s5 + $0x48] sm:$0xf0] }
  0xba   : > { %v481_v32 = vpack.c.bf16 %v467_v31, %v466_v30  ;;  %v1109_v31 = vor.u32 %v1167_v27, %v1108_v26 }
  0xbb   : > { %v418_v33 = vpop.f32.mrf.mxu0 }
  0xbc   : > { %1067 = vmatmul.msk.bf16.gmra.mxu1 %vm524_vm1, %v481_v32  ;;  %v419_v34 = vadd.f32 %v1524_v15, %v418_v33  ;;  %743 = vmatpush.bf16.msra.mxu2 %v1109_v31 }
  0xbe   : > { %v452_v36 = vmul.f32 0.01, %v419_v34 }
  0xc0   : > { %v468_v39 = vmax.f32 %v419_v34, %v452_v36  ;;  %v1113_v34 = vor.u32 %v1166_v28, %v1110_v29 }
  0xc2   : > { %792 = vmatpush.bf16.msra.mxu3 %v1113_v34 }
  0xc3   : > { %v420_v35 = vpop.f32.mrf.mxu0 }
  0xc4   : > { %v421_v37 = vadd.f32 %v1524_v15, %v420_v35 }
  0xc6   : > { %v453_v38 = vmul.f32 0.01, %v421_v37 }
  0xc8   : > { %v469_v40 = vmax.f32 %v421_v37, %v453_v38  ;;  %v1100_v38 = vld [vmem:[%s1782_s5 + $0x30] sm:$0xf] }
  0xca   : > { %v482_v41 = vpack.c.bf16 %v469_v40, %v468_v39  ;;  %v1165_v39 = vld [vmem:[%s1782_s5 + $0x34] sm:$0xf0]  ;;  %v1164_v40 = vld [vmem:[%s1782_s5 + $0x34] sm:$0xf] }
  0xcb   : > { %v423_v42 = vpop.f32.mrf.mxu0 }
  0xcc   : > { %1068 = vmatmul.msk.bf16.gmra.mxu1 %vm524_vm1, %v482_v41  ;;  %v424_v43 = vadd.f32 %v1524_v15, %v423_v42  ;;  %v1101_v41 = vor.u32 %v1165_v39, %v1100_v38  ;;  %v1102_v42 = vld [vmem:[%s1782_s5 + $0x38] sm:$0xf0] }
  0xce   : > { %v454_v45 = vmul.f32 0.01, %v424_v43  ;;  %744 = vmatpush.bf16.msra.mxu2 %v1101_v41 }
  0xd0   : > { %v470_v48 = vmax.f32 %v424_v43, %v454_v45 }
  0xd3   : > { %v425_v44 = vpop.f32.mrf.mxu0 }
  0xd4   : > { %v426_v46 = vadd.f32 %v1524_v15, %v425_v44  ;;  %v1105_v44 = vor.u32 %v1164_v40, %v1102_v42 }
  0xd6   : > { %v455_v47 = vmul.f32 0.01, %v426_v46  ;;  %793 = vmatpush.bf16.msra.mxu3 %v1105_v44 }
  0xd8   : > { %v471_v49 = vmax.f32 %v426_v46, %v455_v47  ;;  %v1092_v46 = vld [vmem:[%s1782_s5 + $0x20] sm:$0xf]  ;;  %v1163_v47 = vld [vmem:[%s1782_s5 + $0x24] sm:$0xf0] }
  0xda   : > { %v483_v50 = vpack.c.bf16 %v471_v49, %v470_v48  ;;  %v1162_v48 = vld [vmem:[%s1782_s5 + $0x24] sm:$0xf]  ;;  %v1093_v49 = vor.u32 %v1163_v47, %v1092_v46 }
  0xdb   : > { %v428_v51 = vpop.f32.mrf.mxu0 }
  0xdc   : > { %1069 = vmatmul.msk.bf16.gmra.mxu1 %vm524_vm1, %v483_v50  ;;  %v429_v52 = vadd.f32 %v1524_v15, %v428_v51  ;;  %v1094_v50 = vld [vmem:[%s1782_s5 + $0x28] sm:$0xf0]  ;;  %745 = vmatpush.bf16.msra.mxu2 %v1093_v49 }
  0xdd   : > { %v1097_v51 = vor.u32 %v1162_v48, %v1094_v50 }
  0xde   : > { %v456_v54 = vmul.f32 0.01, %v429_v52 }
  0xdf   : > { %794 = vmatpush.bf16.msra.mxu3 %v1097_v51 }
  0xe0   : > { %v472_v57 = vmax.f32 %v429_v52, %v456_v54  ;;  %v1161_v54 = vld [vmem:[%s1782_s5 + $0x14] sm:$0xf0] }
  0xe3   : > { %v430_v53 = vpop.f32.mrf.mxu0 }
  0xe4   : > { %v431_v55 = vadd.f32 %v1524_v15, %v430_v53  ;;  %v1084_v53 = vld [vmem:[%s1782_s5 + $0x10] sm:$0xf] }
  0xe6   : > { %v457_v56 = vmul.f32 0.01, %v431_v55 }
  0xe8   : > { %v473_v58 = vmax.f32 %v431_v55, %v457_v56  ;;  %v1160_v55 = vld [vmem:[%s1782_s5 + $0x14] sm:$0xf]  ;;  %v1085_v56 = vor.u32 %v1161_v54, %v1084_v53 }
  0xea   : > { %v484_v59 = vpack.c.bf16 %v473_v58, %v472_v57  ;;  %v1086_v57 = vld [vmem:[%s1782_s5 + $0x18] sm:$0xf0]  ;;  %746 = vmatpush.bf16.msra.mxu2 %v1085_v56 }
  0xeb   : > { %v433_v60 = vpop.f32.mrf.mxu0  ;;  %v1089_v58 = vor.u32 %v1160_v55, %v1086_v57 }
  0xec   : > { %1070 = vmatmul.msk.bf16.gmra.mxu1 %vm524_vm1, %v484_v59  ;;  %v434_v61 = vadd.f32 %v1524_v15, %v433_v60 }
  0xed   : > { %795 = vmatpush.bf16.msra.mxu3 %v1089_v58 }
  0xee   : > { %v458_v63 = vmul.f32 0.01, %v434_v61 }
  0xf0   : > { %v474_v2 = vmax.f32 %v434_v61, %v458_v63  ;;  %v1159_v63 = vld [vmem:[%s1782_s5 + $0x4] sm:$0xf0] }
  0xf3   : > { %v435_v62 = vpop.f32.mrf.mxu0 }
  0xf4   : > { %v436_v0 = vadd.f32 %v1524_v15, %v435_v62  ;;  %v1076_v62 = vld [vmem:[%s1782_s5] sm:$0xf] }
  0xf6   : > { %v459_v1 = vmul.f32 0.01, %v436_v0 }
  0xf8   : > { %v475_v3 = vmax.f32 %v436_v0, %v459_v1  ;;  %v1158_v0 = vld [vmem:[%s1782_s5 + $0x4] sm:$0xf]  ;;  %v1077_v1 = vor.u32 %v1159_v63, %v1076_v62 }
  0xfa   : > { %v485_v9 = vpack.c.bf16 %v475_v3, %v474_v2  ;;  %v1078_v2 = vld [vmem:[%s1782_s5 + $0x8] sm:$0xf0]  ;;  %747 = vmatpush.bf16.msra.mxu2 %v1077_v1 }
  0xfb   : > { %v438_v11 = vpop.f32.mrf.mxu0 }
  0xfc   : > { %1071 = vmatmul.msk.bf16.gmra.mxu1 %vm524_vm1, %v485_v9  ;;  %v439_v24 = vadd.f32 %v1524_v15, %v438_v11 }
  0xfe   : > { %v460_v32 = vmul.f32 0.01, %v439_v24 }
 0x100   : > { %v476_v36 = vmax.f32 %v439_v24, %v460_v32 }
 0x103   : > { %v440_v30 = vpop.f32.mrf.mxu0 }
 0x104   : > { %v441_v33 = vadd.f32 %v1524_v15, %v440_v30 }
 0x106   : > { %v461_v35 = vmul.f32 0.01, %v441_v33 }
 0x108   : > { %v477_v37 = vmax.f32 %v441_v33, %v461_v35 }
 0x10a   : > { %v486_v43 = vpack.c.bf16 %v477_v37, %v476_v36 }
 0x10b   : > { %v443_v45 = vpop.f32.mrf.mxu0 }
 0x10c   : > { %1072 = vmatmul.msk.bf16.gmra.mxu1 %vm524_vm1, %v486_v43  ;;  %v444_v52 = vadd.f32 %v1524_v15, %v443_v45 }
 0x10e   : > { %v462_v59 = vmul.f32 0.01, %v444_v52 }
 0x110   : > { %v478_v4 = vmax.f32 %v444_v52, %v462_v59 }
 0x113   : > { %v445_v60 = vpop.f32.mrf.mxu0 }
 0x114   : > { %v446_v61 = vadd.f32 %v1524_v15, %v445_v60  ;;  %v1081_v15 = vor.u32 %v1158_v0, %v1078_v2 }
 0x116   : > { %v463_v3 = vmul.f32 0.01, %v446_v61  ;;  %796 = vmatpush.bf16.msra.mxu3 %v1081_v15 }
 0x118   : > { %v479_v5 = vmax.f32 %v446_v61, %v463_v3 }
 0x11a   : > { %v487_v6 = vpack.c.bf16 %v479_v5, %v478_v4 }
 0x11c   : > { %1073 = vmatmul.msk.bf16.gmra.mxu1 %vm524_vm1, %v487_v6 }
 0x129   : > { %v558_v7 = vpop.f32.mrf.mxu1 }
 0x12a   : > { %v559_v9 = vadd.f32 %v1649_v8, %v558_v7 }
 0x12c   : > { %v598_v11 = vmul.f32 0.01, %v559_v9 }
 0x12e   : > { %v614_v14 = vmax.f32 %v559_v9, %v598_v11 }
 0x131   : > { %v560_v10 = vpop.f32.mrf.mxu1 }
 0x132   : > { %v561_v12 = vadd.f32 %v1649_v8, %v560_v10 }
 0x134   : > { %v599_v13 = vmul.f32 0.01, %v561_v12 }
 0x136   : > { %v615_v16 = vmax.f32 %v561_v12, %v599_v13 }
 0x138   : > { %v630_v17 = vpack.c.bf16 %v615_v16, %v614_v14 }
 0x139   : > { %v563_v18 = vpop.f32.mrf.mxu1 }
 0x13a   : > { %748 = vmatmul.bf16.vlgmr.msra.gmra.mxu2 %v630_v17  ;;  %797 = vmatmul.bf16.vlgmr.msra.gmra.mxu3 %v630_v17  ;;  %v564_v19 = vadd.f32 %v1649_v8, %v563_v18  ;;  %v654_v18 = vld [vmem:[%s1783_s6] sm:$0x3] }
 0x13c   : > { %v600_v21 = vmul.f32 0.01, %v564_v19 }
 0x13e   : > { %v616_v24 = vmax.f32 %v564_v19, %v600_v21  ;;  %v1670_v19 = vperm.slane %v654_v18, 0 }
 0x141   : > { %v565_v20 = vpop.f32.mrf.mxu1 }
 0x142   : > { %v566_v22 = vadd.f32 %v1649_v8, %v565_v20  ;;  %v1672_v20 = vperm.slane %v654_v18, 1 }
 0x144   : > { %v601_v23 = vmul.f32 0.01, %v566_v22 }
 0x146   : > { %v617_v25 = vmax.f32 %v566_v22, %v601_v23 }
 0x148   : > { %v631_v26 = vpack.c.bf16 %v617_v25, %v616_v24 }
 0x149   : > { %v568_v27 = vpop.f32.mrf.mxu1 }
 0x14a   : > { %753 = vmatmul.bf16.gmra.mxu2 %v631_v26  ;;  %802 = vmatmul.bf16.gmra.mxu3 %v631_v26  ;;  %v569_v28 = vadd.f32 %v1649_v8, %v568_v27 }
 0x14c   : > { %v602_v30 = vmul.f32 0.01, %v569_v28 }
 0x14e   : > { %v618_v33 = vmax.f32 %v569_v28, %v602_v30 }
 0x151   : > { %v570_v29 = vpop.f32.mrf.mxu1 }
 0x152   : > { %v571_v31 = vadd.f32 %v1649_v8, %v570_v29 }
 0x154   : > { %v603_v32 = vmul.f32 0.01, %v571_v31 }
 0x156   : > { %v619_v34 = vmax.f32 %v571_v31, %v603_v32 }
 0x158   : > { %v632_v35 = vpack.c.bf16 %v619_v34, %v618_v33 }
 0x159   : > { %v573_v36 = vpop.f32.mrf.mxu1 }
 0x15a   : > { %758 = vmatmul.bf16.gmra.mxu2 %v632_v35  ;;  %807 = vmatmul.bf16.gmra.mxu3 %v632_v35  ;;  %v574_v37 = vadd.f32 %v1649_v8, %v573_v36 }
 0x15c   : > { %v604_v39 = vmul.f32 0.01, %v574_v37 }
 0x15e   : > { %v620_v42 = vmax.f32 %v574_v37, %v604_v39 }
 0x161   : > { %v575_v38 = vpop.f32.mrf.mxu1 }
 0x162   : > { %v576_v40 = vadd.f32 %v1649_v8, %v575_v38 }
 0x164   : > { %v605_v41 = vmul.f32 0.01, %v576_v40 }
 0x166   : > { %v621_v43 = vmax.f32 %v576_v40, %v605_v41 }
 0x168   : > { %v633_v44 = vpack.c.bf16 %v621_v43, %v620_v42 }
 0x169   : > { %v578_v45 = vpop.f32.mrf.mxu1 }
 0x16a   : > { %763 = vmatmul.bf16.gmra.mxu2 %v633_v44  ;;  %812 = vmatmul.bf16.gmra.mxu3 %v633_v44  ;;  %v579_v46 = vadd.f32 %v1649_v8, %v578_v45 }
 0x16c   : > { %v606_v48 = vmul.f32 0.01, %v579_v46 }
 0x16e   : > { %v622_v51 = vmax.f32 %v579_v46, %v606_v48 }
 0x171   : > { %v580_v47 = vpop.f32.mrf.mxu1 }
 0x172   : > { %v581_v49 = vadd.f32 %v1649_v8, %v580_v47 }
 0x174   : > { %v607_v50 = vmul.f32 0.01, %v581_v49 }
 0x176   : > { %v623_v52 = vmax.f32 %v581_v49, %v607_v50 }
 0x178   : > { %v634_v53 = vpack.c.bf16 %v623_v52, %v622_v51 }
 0x179   : > { %v583_v54 = vpop.f32.mrf.mxu1 }
 0x17a   : > { %768 = vmatmul.bf16.gmra.mxu2 %v634_v53  ;;  %817 = vmatmul.bf16.gmra.mxu3 %v634_v53  ;;  %v584_v55 = vadd.f32 %v1649_v8, %v583_v54 }
 0x17c   : > { %v608_v57 = vmul.f32 0.01, %v584_v55 }
 0x17e   : > { %v624_v60 = vmax.f32 %v584_v55, %v608_v57 }
 0x181   : > { %v585_v56 = vpop.f32.mrf.mxu1 }
 0x182   : > { %v586_v58 = vadd.f32 %v1649_v8, %v585_v56 }
 0x184   : > { %v609_v59 = vmul.f32 0.01, %v586_v58 }
 0x186   : > { %v625_v61 = vmax.f32 %v586_v58, %v609_v59 }
 0x188   : > { %v635_v62 = vpack.c.bf16 %v625_v61, %v624_v60 }
 0x189   : > { %v588_v63 = vpop.f32.mrf.mxu1 }
 0x18a   : > { %773 = vmatmul.bf16.gmra.mxu2 %v635_v62  ;;  %822 = vmatmul.bf16.gmra.mxu3 %v635_v62  ;;  %v589_v0 = vadd.f32 %v1649_v8, %v588_v63 }
 0x18c   : > { %v610_v2 = vmul.f32 0.01, %v589_v0 }
 0x18e   : > { %v626_v4 = vmax.f32 %v589_v0, %v610_v2 }
 0x191   : > { %v590_v1 = vpop.f32.mrf.mxu1 }
 0x192   : > { %v591_v3 = vadd.f32 %v1649_v8, %v590_v1 }
 0x194   : > { %v611_v15 = vmul.f32 0.01, %v591_v3 }
 0x196   : > { %v627_v5 = vmax.f32 %v591_v3, %v611_v15 }
 0x198   : > { %v636_v6 = vpack.c.bf16 %v627_v5, %v626_v4 }
 0x199   : > { %v593_v7 = vpop.f32.mrf.mxu1 }
 0x19a   : > { %778 = vmatmul.bf16.gmra.mxu2 %v636_v6  ;;  %827 = vmatmul.bf16.gmra.mxu3 %v636_v6  ;;  %v594_v9 = vadd.f32 %v1649_v8, %v593_v7 }
 0x19c   : > { %v612_v11 = vmul.f32 0.01, %v594_v9 }
 0x19e   : > { %v628_v14 = vmax.f32 %v594_v9, %v612_v11 }
 0x1a1   : > { %v595_v10 = vpop.f32.mrf.mxu1 }
 0x1a2   : > { %v596_v12 = vadd.f32 %v1649_v8, %v595_v10 }
 0x1a4   : > { %v613_v13 = vmul.f32 0.01, %v596_v12 }
 0x1a6   : > { %v629_v16 = vmax.f32 %v596_v12, %v613_v13 }
 0x1a8   : > { %v637_v17 = vpack.c.bf16 %v629_v16, %v628_v14 }
 0x1aa   : > { %783 = vmatmul.bf16.gmra.mxu2 %v637_v17  ;;  %832 = vmatmul.bf16.gmra.mxu3 %v637_v17 }
 0x1bd   : > { %v749_v21 = vpop.f32.mrf.mxu2  ;;  %v798_v22 = vpop.f32.mrf.mxu3 }
 0x1be   : > { %v750_v8 = vadd.f32 %v749_v21, %v1670_v19  ;;  %v799_v23 = vadd.f32 %v798_v22, %v1672_v20 }
 0x1c0   : > { %1232 = vtanh.f32 %v750_v8 }
 0x1c1   : > { %1234 = vtanh.f32 %v799_v23 }
 0x1c5   : > { %v751_v24 = vpop.f32.mrf.mxu2  ;;  %v800_v25 = vpop.f32.mrf.mxu3 }
 0x1c6   : > { %v1233_v26 = vpop.eup %1232  ;;  %v752_v27 = vadd.f32 %v751_v24, %v1670_v19  ;;  %v801_v28 = vadd.f32 %v800_v25, %v1672_v20 }
 0x1c7   : > { %v1235_v29 = vpop.eup %1234  ;;  %870 = vst [vmem:[%s1681_s21] sm:$0xff] %v1233_v26 }
 0x1c8   : > { %871 = vst [vmem:[%s1681_s21 + $0x8] sm:$0xff] %v1235_v29  ;;  %1236 = vtanh.f32 %v752_v27 }
 0x1c9   : > { %1238 = vtanh.f32 %v801_v28 }
 0x1cd   : > { %v754_v30 = vpop.f32.mrf.mxu2  ;;  %v803_v31 = vpop.f32.mrf.mxu3 }
 0x1ce   : > { %v1237_v32 = vpop.eup %1236  ;;  %v755_v33 = vadd.f32 %v754_v30, %v1670_v19  ;;  %v804_v34 = vadd.f32 %v803_v31, %v1672_v20 }
 0x1cf   : > { %v1239_v35 = vpop.eup %1238  ;;  %872 = vst [vmem:[%s1681_s21 + $0x10] sm:$0xff] %v1237_v32 }
 0x1d0   : > { %873 = vst [vmem:[%s1681_s21 + $0x18] sm:$0xff] %v1239_v35  ;;  %1240 = vtanh.f32 %v755_v33 }
 0x1d1   : > { %1242 = vtanh.f32 %v804_v34 }
 0x1d5   : > { %v756_v36 = vpop.f32.mrf.mxu2  ;;  %v805_v37 = vpop.f32.mrf.mxu3 }
 0x1d6   : > { %v1241_v38 = vpop.eup %1240  ;;  %v757_v39 = vadd.f32 %v756_v36, %v1670_v19  ;;  %v806_v40 = vadd.f32 %v805_v37, %v1672_v20 }
 0x1d7   : > { %v1243_v41 = vpop.eup %1242  ;;  %874 = vst [vmem:[%s1681_s21 + $0x20] sm:$0xff] %v1241_v38 }
 0x1d8   : > { %875 = vst [vmem:[%s1681_s21 + $0x28] sm:$0xff] %v1243_v41  ;;  %1244 = vtanh.f32 %v757_v39 }
 0x1d9   : > { %1246 = vtanh.f32 %v806_v40 }
 0x1dd   : > { %v759_v42 = vpop.f32.mrf.mxu2  ;;  %v808_v43 = vpop.f32.mrf.mxu3 }
 0x1de   : > { %v1245_v44 = vpop.eup %1244  ;;  %v760_v45 = vadd.f32 %v759_v42, %v1670_v19  ;;  %v809_v46 = vadd.f32 %v808_v43, %v1672_v20 }
 0x1df   : > { %v1247_v47 = vpop.eup %1246  ;;  %876 = vst [vmem:[%s1681_s21 + $0x30] sm:$0xff] %v1245_v44 }
 0x1e0   : > { %877 = vst [vmem:[%s1681_s21 + $0x38] sm:$0xff] %v1247_v47  ;;  %1248 = vtanh.f32 %v760_v45 }
 0x1e1   : > { %1250 = vtanh.f32 %v809_v46 }
 0x1e5   : > { %v761_v48 = vpop.f32.mrf.mxu2  ;;  %v810_v49 = vpop.f32.mrf.mxu3 }
 0x1e6   : > { %v1249_v50 = vpop.eup %1248  ;;  %v762_v51 = vadd.f32 %v761_v48, %v1670_v19  ;;  %v811_v52 = vadd.f32 %v810_v49, %v1672_v20 }
 0x1e7   : > { %v1251_v53 = vpop.eup %1250  ;;  %878 = vst [vmem:[%s1681_s21 + $0x40] sm:$0xff] %v1249_v50 }
 0x1e8   : > { %879 = vst [vmem:[%s1681_s21 + $0x48] sm:$0xff] %v1251_v53  ;;  %1252 = vtanh.f32 %v762_v51 }
 0x1e9   : > { %1254 = vtanh.f32 %v811_v52 }
 0x1ed   : > { %v764_v54 = vpop.f32.mrf.mxu2  ;;  %v813_v55 = vpop.f32.mrf.mxu3 }
 0x1ee   : > { %v1253_v56 = vpop.eup %1252  ;;  %v765_v57 = vadd.f32 %v764_v54, %v1670_v19  ;;  %v814_v58 = vadd.f32 %v813_v55, %v1672_v20 }
 0x1ef   : > { %v1255_v59 = vpop.eup %1254  ;;  %880 = vst [vmem:[%s1681_s21 + $0x50] sm:$0xff] %v1253_v56 }
 0x1f0   : > { %881 = vst [vmem:[%s1681_s21 + $0x58] sm:$0xff] %v1255_v59  ;;  %1256 = vtanh.f32 %v765_v57 }
 0x1f1   : > { %1258 = vtanh.f32 %v814_v58 }
 0x1f5   : > { %v766_v60 = vpop.f32.mrf.mxu2  ;;  %v815_v61 = vpop.f32.mrf.mxu3 }
 0x1f6   : > { %v1257_v62 = vpop.eup %1256  ;;  %v767_v63 = vadd.f32 %v766_v60, %v1670_v19  ;;  %v816_v0 = vadd.f32 %v815_v61, %v1672_v20 }
 0x1f7   : > { %v1259_v1 = vpop.eup %1258  ;;  %882 = vst [vmem:[%s1681_s21 + $0x60] sm:$0xff] %v1257_v62 }
 0x1f8   : > { %883 = vst [vmem:[%s1681_s21 + $0x68] sm:$0xff] %v1259_v1  ;;  %1260 = vtanh.f32 %v767_v63 }
 0x1f9   : > { %1262 = vtanh.f32 %v816_v0 }
 0x1fd   : > { %v769_v2 = vpop.f32.mrf.mxu2  ;;  %v818_v3 = vpop.f32.mrf.mxu3 }
 0x1fe   : > { %v1261_v15 = vpop.eup %1260  ;;  %v770_v4 = vadd.f32 %v769_v2, %v1670_v19  ;;  %v819_v5 = vadd.f32 %v818_v3, %v1672_v20 }
 0x1ff   : > { %v1263_v6 = vpop.eup %1262  ;;  %884 = vst [vmem:[%s1681_s21 + $0x70] sm:$0xff] %v1261_v15 }
 0x200   : > { %885 = vst [vmem:[%s1681_s21 + $0x78] sm:$0xff] %v1263_v6  ;;  %1264 = vtanh.f32 %v770_v4 }
 0x201   : > { %1266 = vtanh.f32 %v819_v5 }
 0x205   : > { %v771_v7 = vpop.f32.mrf.mxu2  ;;  %v820_v9 = vpop.f32.mrf.mxu3 }
 0x206   : > { %v1265_v10 = vpop.eup %1264  ;;  %v772_v11 = vadd.f32 %v771_v7, %v1670_v19  ;;  %v821_v12 = vadd.f32 %v820_v9, %v1672_v20 }
 0x207   : > { %v1267_v13 = vpop.eup %1266  ;;  %886 = vst [vmem:[%s1681_s21 + $0x80] sm:$0xff] %v1265_v10 }
 0x208   : > { %887 = vst [vmem:[%s1681_s21 + $0x88] sm:$0xff] %v1267_v13  ;;  %1268 = vtanh.f32 %v772_v11 }
 0x209   : > { %1270 = vtanh.f32 %v821_v12 }
 0x20d   : > { %v774_v14 = vpop.f32.mrf.mxu2  ;;  %v823_v16 = vpop.f32.mrf.mxu3 }
 0x20e   : > { %v1269_v17 = vpop.eup %1268  ;;  %v775_v18 = vadd.f32 %v774_v14, %v1670_v19  ;;  %v824_v21 = vadd.f32 %v823_v16, %v1672_v20 }
 0x20f   : > { %v1271_v22 = vpop.eup %1270  ;;  %888 = vst [vmem:[%s1681_s21 + $0x90] sm:$0xff] %v1269_v17 }
 0x210   : > { %889 = vst [vmem:[%s1681_s21 + $0x98] sm:$0xff] %v1271_v22  ;;  %1272 = vtanh.f32 %v775_v18 }
 0x211   : > { %1274 = vtanh.f32 %v824_v21 }
 0x215   : > { %v776_v8 = vpop.f32.mrf.mxu2  ;;  %v825_v23 = vpop.f32.mrf.mxu3 }
 0x216   : > { %v1273_v24 = vpop.eup %1272  ;;  %v777_v25 = vadd.f32 %v776_v8, %v1670_v19  ;;  %v826_v26 = vadd.f32 %v825_v23, %v1672_v20 }
 0x217   : > { %v1275_v27 = vpop.eup %1274  ;;  %890 = vst [vmem:[%s1681_s21 + $0xa0] sm:$0xff] %v1273_v24 }
 0x218   : > { %891 = vst [vmem:[%s1681_s21 + $0xa8] sm:$0xff] %v1275_v27  ;;  %1276 = vtanh.f32 %v777_v25 }
 0x219   : > { %1278 = vtanh.f32 %v826_v26 }
 0x21d   : > { %v779_v28 = vpop.f32.mrf.mxu2  ;;  %v828_v29 = vpop.f32.mrf.mxu3 }
 0x21e   : > { %v1277_v30 = vpop.eup %1276  ;;  %v780_v31 = vadd.f32 %v779_v28, %v1670_v19  ;;  %v829_v32 = vadd.f32 %v828_v29, %v1672_v20 }
 0x21f   : > { %v1279_v33 = vpop.eup %1278  ;;  %892 = vst [vmem:[%s1681_s21 + $0xb0] sm:$0xff] %v1277_v30 }
 0x220   : > { %893 = vst [vmem:[%s1681_s21 + $0xb8] sm:$0xff] %v1279_v33  ;;  %1280 = vtanh.f32 %v780_v31 }
 0x221   : > { %1282 = vtanh.f32 %v829_v32 }
 0x225   : > { %v781_v34 = vpop.f32.mrf.mxu2  ;;  %v830_v35 = vpop.f32.mrf.mxu3 }
 0x226   : > { %v1281_v36 = vpop.eup %1280  ;;  %v782_v37 = vadd.f32 %v781_v34, %v1670_v19  ;;  %v831_v38 = vadd.f32 %v830_v35, %v1672_v20 }
 0x227   : > { %v1283_v39 = vpop.eup %1282  ;;  %894 = vst [vmem:[%s1681_s21 + $0xc0] sm:$0xff] %v1281_v36 }
 0x228   : > { %895 = vst [vmem:[%s1681_s21 + $0xc8] sm:$0xff] %v1283_v39  ;;  %1284 = vtanh.f32 %v782_v37 }
 0x229   : > { %1286 = vtanh.f32 %v831_v38 }
 0x22d   : > { %v784_v40 = vpop.f32.mrf.mxu2  ;;  %v833_v41 = vpop.f32.mrf.mxu3 }
 0x22e   : > { %v1285_v42 = vpop.eup %1284  ;;  %v785_v43 = vadd.f32 %v784_v40, %v1670_v19  ;;  %v834_v44 = vadd.f32 %v833_v41, %v1672_v20 }
 0x22f   : > { %v1287_v45 = vpop.eup %1286  ;;  %896 = vst [vmem:[%s1681_s21 + $0xd0] sm:$0xff] %v1285_v42 }
 0x230   : > { %897 = vst [vmem:[%s1681_s21 + $0xd8] sm:$0xff] %v1287_v45  ;;  %1288 = vtanh.f32 %v785_v43 }
 0x231   : > { %1290 = vtanh.f32 %v834_v44 }
 0x235   : > { %v786_v46 = vpop.f32.mrf.mxu2  ;;  %v835_v47 = vpop.f32.mrf.mxu3 }
 0x236   : > { %v1289_v48 = vpop.eup %1288  ;;  %v787_v49 = vadd.f32 %v786_v46, %v1670_v19  ;;  %v836_v50 = vadd.f32 %v835_v47, %v1672_v20 }
 0x237   : > { %v1291_v51 = vpop.eup %1290  ;;  %898 = vst [vmem:[%s1681_s21 + $0xe0] sm:$0xff] %v1289_v48 }
 0x238   : > { %899 = vst [vmem:[%s1681_s21 + $0xe8] sm:$0xff] %v1291_v51  ;;  %1292 = vtanh.f32 %v787_v49 }
 0x239   : > { %1294 = vtanh.f32 %v836_v50 }
 0x23e   : > { %v1293_v52 = vpop.eup %1292 }
 0x23f   : > { %v1295_v53 = vpop.eup %1294  ;;  %900 = vst [vmem:[%s1681_s21 + $0xf0] sm:$0xff] %v1293_v52 }
 0x240   : > { %901 = vst [vmem:[%s1681_s21 + $0xf8] sm:$0xff] %v1295_v53 }
 0x241   : > { %1353 = shalt.err (!%p1350_p8)
}
 0x242   : > { %s1397_s19 = smov 256   ;;  %s1398_s21 = smov 16  }
 0x243   : > { %1180 = dma.vmem_to_hbm [thread:$0]  (%p1477_p5), %s917_s28, 4096, %s919_s9, %s903_s13, %s1397_s19, %s1397_s19, %s1398_s21  }
 0x244 PF: > { %p1192_p9 = scmp.ge.s32.totalorder %s1392_s27, 2  ;;  %s933_s23 = sand.u32 1, %s1380_s24  }
 0x245   : > { %s934_s29 = scalar_lea.sflag [#allocation4], %s933_s23 }
 0x246   : > { %p1187_p10 = pnand %p1192_p9, %p1481_p6 }
 0x248   : > { %p1188_p11 = pneg %p1187_p10 }
 0x24a   : > { %1375 = dma.done.wait (%p1188_p11), %s934_s29, 4096  }
 0x24b   : > { %1377 = vsyncadd (%p1188_p11), %s934_s29, 4294963200  ;;  %p18_p12 = scmp.ge.s32.totalorder %s1464_s30, 4   ;;  %s1787_s24 = smov %s1384_s25 }
 0x24c   : > { %s1788_s25 = smov %s1388_s26  ;;  %s1789_s26 = smov %s1475_s10 }
 0x24d   : > { %s1790_s27 = smov %s1464_s30  ;;  %20 = sbr.rel (!%p18_p12) target bundleno = 4 (0x4), region = 88 }
 0x252   :  { %940 = vsyncpa [#allocation3], 1 }
 0x253   :  { %942 = vsyncpa [#allocation3 + $0x1], 1 }
 0x254   :  { %943 = vsyncpa [#allocation4], 1 }
 0x255   :  { %945 = vsyncpa [#allocation4 + $0x1], 1 }

</bundles_post_ra>
